<compile_context>
chip_gen: v7x
topology: tpu7x:2x2x1
jax: 0.10.0
libtpu: 0.0.40
codegen_flags: <defaults>
</compile_context>

<pallas_src>
import functools

import jax
import jax.numpy as jnp
from jax.experimental import pallas as pl
from jax.experimental.pallas import tpu as pltpu


# ---------------------------------------------------------------- style affine
def _affine_kernel(latent_ref, w_ref, b_ref, o_ref, *, negative_slope):
    # latent: (N, L), w: (2C, L) [PyTorch (c_out, c_in) layout], b: (1, 2C)
    lat = latent_ref[...].astype(jnp.float32)
    w = w_ref[...].astype(jnp.float32)
    a = jax.lax.dot_general(lat, w,
                            dimension_numbers=(((1,), (1,)), ((), ())),
                            preferred_element_type=jnp.float32) + b_ref[...]
    o_ref[...] = jnp.where(a >= 0, a, negative_slope * a).astype(o_ref.dtype)


# ---------------------------------------------------- fused single-pass AdaIN
def _fused_adain_kernel(x_ref, s_ref, t_ref, o_ref, *, eps):
    # x: (R, HW) resident slab; everything per-row, one HBM read + one HBM write.
    # TODO(synk): on v6e/v7x with bf16 inputs the FMA could stay in bf16; kept f32
    # for v5e (no bf16 VALU) and numerical headroom.
    x = x_ref[...].astype(jnp.float32)                       # (R, HW)
    hw = x.shape[1]
    mean = jnp.sum(x, axis=1, keepdims=True) * (1.0 / hw)    # (R, 1)
    xc = x - mean
    var = jnp.sum(xc * xc, axis=1, keepdims=True) * (1.0 / hw)   # biased (InstanceNorm2d)
    scale = (s_ref[...] + 1.0) * jax.lax.rsqrt(var + eps)
    o_ref[...] = (xc * scale + t_ref[...]).astype(o_ref.dtype)


# ------------------------------------- two-pass fallback: stats -> scale/shift
def _stats_scale_shift_kernel(x_ref, s_ref, t_ref, scale_ref, shift_ref,
                              sum_sc, ssq_sc, ref_sc, *, hw, t_hw, eps):
    h = pl.program_id(1)

    @pl.when(h == 0)
    def _():
        # Per-row shift (first pixel) so the across-tile variance formula is not
        # subject to catastrophic cancellation for large-mean inputs.
        ref_sc[...] = x_ref[:, 0:1].astype(jnp.float32)
        sum_sc[...] = jnp.zeros_like(sum_sc)
        ssq_sc[...] = jnp.zeros_like(ssq_sc)

    xs = x_ref[...].astype(jnp.float32) - ref_sc[...]        # (R, t_hw)
    if hw % t_hw != 0:
        lane = jax.lax.broadcasted_iota(jnp.int32, xs.shape, 1)
        xs = jnp.where(h * t_hw + lane < hw, xs, 0.0)        # mask padded lanes
    sum_sc[...] += jnp.sum(xs, axis=1, keepdims=True)
    ssq_sc[...] += jnp.sum(xs * xs, axis=1, keepdims=True)

    @pl.when(h == pl.num_programs(1) - 1)
    def _():
        mean_s = sum_sc[...] * (1.0 / hw)                    # mean of shifted x
        var = ssq_sc[...] * (1.0 / hw) - mean_s * mean_s     # shift-invariant
        scale = (s_ref[...] + 1.0) * jax.lax.rsqrt(var + eps)
        scale_ref[...] = scale
        shift_ref[...] = t_ref[...] - (mean_s + ref_sc[...]) * scale


def _apply_kernel(x_ref, scale_ref, shift_ref, o_ref):
    x = x_ref[...].astype(jnp.float32)
    o_ref[...] = (x * scale_ref[...] + shift_ref[...]).astype(o_ref.dtype)


# ------------------------------------------------------------------- helpers
def _round_up(v, m):
    return (v + m - 1) // m * m


def _vmem_caps():
    """(scoped_limit_bytes, tile_budget_bytes) derived from the chip's VMEM."""
    cap = 64 * 1024 * 1024                      # conservative fallback (v7x per-TC)
    try:
        cap = int(getattr(pltpu.get_tpu_info(), "vmem_capacity_bytes", cap))
    except Exception:
        pass
    scoped = int(cap * 3 // 4)                  # what we ask the compiler for
    budget = int(cap // 2)                      # what we size our tiles against
    return scoped, budget


# ------------------------------------------------------------------- wrapper
def adain_forward(x, latent, w, b, *, eps=1e-5, negative_slope=0.2):
    """AdaIn forward.
    x: (N, C, H, W); latent: (N, L); w: (2C, L) (PyTorch layout); b: (2C,).
    Returns (N, C, H, W) with the dtype of x."""
    N, C, H, W = x.shape
    HW = H * W
    NC = N * C
    L = latent.shape[1]
    assert w.shape == (2 * C, L) and b.shape == (2 * C,)

    itemsize = x.dtype.itemsize
    scoped, budget = _vmem_caps()

    # Sublane-packed layout: rows = (n, c) pairs, lanes = pixels.
    x_flat = x.reshape(NC, HW)

    # --- 1. style affine: a = LeakyReLU(latent @ w.T + b) ----------------------
    a = pl.pallas_call(
        functools.partial(_affine_kernel, negative_slope=negative_slope),
        out_shape=jax.ShapeDtypeStruct((N, 2 * C), jnp.float32),
    )(latent, w, b.reshape(1, 2 * C))
    s = a[:, :C].reshape(NC, 1)
    t = a[:, C:].reshape(NC, 1)

    # --- 2. pick path: fused single pass if a >=8-row full-HW slab fits VMEM ---
    # per-row bytes: double-buffered in + out (2x each) + ~3 f32 temporaries.
    per_row_bytes = HW * (4 * itemsize + 3 * 4)
    rows_budget = (budget // max(per_row_bytes, 1)) // 8 * 8
    # keep individual x tiles <= ~8 MiB so the pipeline still overlaps DMA/compute
    tile_cap_rows = max(8, (8 * 1024 * 1024 // max(HW * itemsize, 1)) // 8 * 8)
    rows_budget = min(rows_budget, tile_cap_rows)

    if rows_budget >= 8:
        # ---------------- fused single-pass path (1 read + 1 write of x) -------
        R = NC if _round_up(NC, 8) <= rows_budget else rows_budget
        y_flat = pl.pallas_call(
            functools.partial(_fused_adain_kernel, eps=eps),
            out_shape=jax.ShapeDtypeStruct((NC, HW), x.dtype),
            grid_spec=pltpu.PrefetchScalarGridSpec(
                num_scalar_prefetch=0,
                grid=(pl.cdiv(NC, R),),
                in_specs=[pl.BlockSpec((R, HW), lambda r: (r, 0)),
                          pl.BlockSpec((R, 1), lambda r: (r, 0)),
                          pl.BlockSpec((R, 1), lambda r: (r, 0))],
                out_specs=pl.BlockSpec((R, HW), lambda r: (r, 0))),
            compiler_params=pltpu.CompilerParams(
                dimension_semantics=("parallel",),
                vmem_limit_bytes=scoped),
        )(x_flat, s, t)
    else:
        # ---------------- two-pass fallback for very large HW ------------------
        rows = NC if NC < 8 else 8
        # lane tile: aim for ~4 MiB of x per tile (HBM-roofline sweet spot) while
        # keeping double-buffered in+out tiles + f32 temps within the VMEM budget.
        t_hw = min(4 * 1024 * 1024 // max(rows * itemsize, 1),
                   budget // max(rows * (4 * itemsize + 3 * 4), 1))
        t_hw = max(128, (t_hw // 128) * 128)
        if t_hw > HW:
            t_hw = HW
        n_hw = pl.cdiv(HW, t_hw)
        n_rows = pl.cdiv(NC, rows)

        scale, shift = pl.pallas_call(
            functools.partial(_stats_scale_shift_kernel, hw=HW, t_hw=t_hw, eps=eps),
            out_shape=(jax.ShapeDtypeStruct((NC, 1), jnp.float32),
                       jax.ShapeDtypeStruct((NC, 1), jnp.float32)),
            grid_spec=pltpu.PrefetchScalarGridSpec(
                num_scalar_prefetch=0,
                grid=(n_rows, n_hw),
                in_specs=[pl.BlockSpec((rows, t_hw), lambda r, h: (r, h)),
                          pl.BlockSpec((rows, 1), lambda r, h: (r, 0)),
                          pl.BlockSpec((rows, 1), lambda r, h: (r, 0))],
                out_specs=(pl.BlockSpec((rows, 1), lambda r, h: (r, 0)),
                           pl.BlockSpec((rows, 1), lambda r, h: (r, 0))),
                scratch_shapes=[pltpu.VMEM((rows, 1), jnp.float32),
                                pltpu.VMEM((rows, 1), jnp.float32),
                                pltpu.VMEM((rows, 1), jnp.float32)]),
            compiler_params=pltpu.CompilerParams(
                dimension_semantics=("parallel", "arbitrary"),
                vmem_limit_bytes=scoped),
        )(x_flat, s, t)

        y_flat = pl.pallas_call(
            _apply_kernel,
            out_shape=jax.ShapeDtypeStruct((NC, HW), x.dtype),
            grid_spec=pltpu.PrefetchScalarGridSpec(
                num_scalar_prefetch=0,
                grid=(n_rows, n_hw),
                in_specs=[pl.BlockSpec((rows, t_hw), lambda r, h: (r, h)),
                          pl.BlockSpec((rows, 1), lambda r, h: (r, 0)),
                          pl.BlockSpec((rows, 1), lambda r, h: (r, 0))],
                out_specs=pl.BlockSpec((rows, t_hw), lambda r, h: (r, h))),
            compiler_params=pltpu.CompilerParams(
                dimension_semantics=("parallel", "parallel"),
                vmem_limit_bytes=scoped),
        )(x_flat, scale, shift)

    return y_flat.reshape(N, C, H, W)


if __name__ == "__main__":
    key = jax.random.PRNGKey(0)
    kx, kl, kw, kb = jax.random.split(key, 4)

    N, C, H, W = 2, 4, 16, 16        # batch=2, channels=4, spatial=16
    L = 8                            # n_latent

    # add a mean offset to exercise the cancellation-safe variance path
    x = 2.0 + jax.random.normal(kx, (N, C, H, W), dtype=jnp.float32)
    latent = jax.random.normal(kl, (N, L), dtype=jnp.float32)
    w = 0.1 * jax.random.normal(kw, (2 * C, L), dtype=jnp.float32)
    b = 0.1 * jax.random.normal(kb, (2 * C,), dtype=jnp.float32)

    y = adain_forward(x, latent, w, b)
    jax.block_until_ready(y)

    # --- pure-JAX reference mirroring the PyTorch AdaIn forward -----------------
    a = latent @ w.T + b
    a = jnp.where(a >= 0, a, 0.2 * a)                    # LeakyReLU(0.2)
    s_ref = a[:, :C].reshape(N, C, 1, 1)
    t_ref = a[:, C:].reshape(N, C, 1, 1)
    mean = x.mean(axis=(2, 3), keepdims=True)
    var = jnp.mean((x - mean) ** 2, axis=(2, 3), keepdims=True)
    ref = (s_ref + 1.0) * (x - mean) * jax.lax.rsqrt(var + 1e-5) + t_ref

    assert y.shape == x.shape and y.dtype == x.dtype
    err = float(jnp.max(jnp.abs(y - ref)))
    assert jnp.allclose(y, ref, atol=1e-4, rtol=1e-4), err
    print("KERNEL_OK")
</pallas_src>

<mosaic_0001>
module attributes {stable_mosaic.version = 11 : i64} {
  func.func @_affine_kernel(%arg0: memref<2x8xf32, #tpu.memory_space<vmem>>, %arg1: memref<8x8xf32, #tpu.memory_space<vmem>>, %arg2: memref<1x8xf32, #tpu.memory_space<vmem>>, %arg3: memref<2x8xf32, #tpu.memory_space<vmem>>) attributes {dimension_semantics = [], scalar_prefetch = 0 : i64, scratch_operands = 0 : i64, tpu.core_type = #tpu.core_type<tc>} {
    %c0 = arith.constant 0 : index
    %c0_0 = arith.constant 0 : index
    %0 = vector.load %arg0[%c0, %c0_0] : memref<2x8xf32, #tpu.memory_space<vmem>>, vector<2x8xf32>
    %c0_1 = arith.constant 0 : index
    %c0_2 = arith.constant 0 : index
    %1 = vector.load %arg1[%c0_1, %c0_2] : memref<8x8xf32, #tpu.memory_space<vmem>>, vector<8x8xf32>
    %cst = arith.constant dense<0.000000e+00> : vector<2x8xf32>
    %2 = tpu.matmul %0, %1, %cst {dimension_numbers = #tpu.dot_dimension_numbers<[1], [1], [0], [0], [0, 0, 1, 0], [], []>} : vector<2x8xf32>, vector<8x8xf32>, vector<2x8xf32> -> vector<2x8xf32>
    %c0_3 = arith.constant 0 : index
    %c0_4 = arith.constant 0 : index
    %3 = vector.load %arg2[%c0_3, %c0_4] : memref<1x8xf32, #tpu.memory_space<vmem>>, vector<1x8xf32>
    %4 = vector.broadcast %3 : vector<1x8xf32> to vector<2x8xf32>
    %5 = arith.addf %2, %4 : vector<2x8xf32>
    %cst_5 = arith.constant 0.000000e+00 : f32
    %6 = vector.broadcast %cst_5 : f32 to vector<2x8xf32>
    %7 = arith.cmpf oge, %5, %6 : vector<2x8xf32>
    %cst_6 = arith.constant 2.000000e-01 : f32
    %8 = vector.broadcast %cst_6 : f32 to vector<2x8xf32>
    %9 = arith.mulf %8, %5 : vector<2x8xf32>
    %10 = arith.select %7, %5, %9 : vector<2x8xi1>, vector<2x8xf32>
    %c0_7 = arith.constant 0 : index
    %c0_8 = arith.constant 0 : index
    %11 = vector.load %arg3[%c0_7, %c0_8] : memref<2x8xf32, #tpu.memory_space<vmem>>, vector<2x8xf32>
    tpu.vector_store %arg3[%c0_7, %c0_8], %10 {strides = array<i32>} : memref<2x8xf32, #tpu.memory_space<vmem>>, vector<2x8xf32>,
    return
  }
}

</mosaic_0001>

<bundles_post_ra>
// kernel: tpu_custom_call.1
= control target key start
LH: loop header
LB: loop body
LE: loop exit
PB: predicated region body
PF: predicated region fallthrough
CT: control target
= control target key end

     0   :  { %8 = vsyncpa [#allocation3], 0  ;;  %s297_s0 = inlined_call_operand.hbm [shape: f32[2,8], index: 0, kind: input, shape index: {}]   ;;  %s298_s1 = inlined_call_operand.hbm [shape: f32[8,8], index: 1, kind: input, shape index: {}]   ;;  %s299_s2 = inlined_call_operand.vmem [shape: f32[1,8], index: 2, kind: input, shape index: {}]   ;;  %s300_s3 = inlined_call_operand.hbm [shape: f32[2,8], index: 3, kind: output, shape index: {}]  }
   0x1   :  { %9 = vsyncpa [#allocation6], 0 }
   0x2   :  { %10 = vsyncpa [#allocation4], 0  ;;  %s233_s12 = smov [#allocation2]   ;;  %s234_s14 = smov [#allocation5]  }
   0x3   :  { %s17_s13 = sshll.u32 %s233_s12, 4  ;;  %s27_s15 = sshll.u32 %s234_s14, 4  ;;  %s18_s13 = int_to_ptr.vmem [resolvable:$true] %s17_s13  ;;  %s28_s15 = int_to_ptr.vmem [resolvable:$true] %s27_s15 }
   0x4   :  { %s161_s18 = scalar_lea.hbm %s297_s0, 32 }
   0x5   :  { %p162_p0 = scmp.ne.s32.totalorder %s297_s0, %s161_s18  ;;  %p165_p1 = scmp.lt.u32.totalorder %s161_s18, %s297_s0 }
   0x7   :  { %p167_p2 = pnand %p165_p1, %p162_p0 }
   0x9   :  { %170 = shalt.err (!%p167_p2)
}
   0xa   :  { %s171_s23 = scalar_lea.vmem %s18_s13, 32  ;;  %p176_p4 = scmp.lt.s32.totalorder %s18_s13, %s18_s13 }
   0xb   :  { %p172_p3 = scmp.ne.s32.totalorder %s18_s13, %s171_s23  ;;  %p177_p5 = scmp.lt.s32.totalorder %s171_s23, %s171_s23 }
   0xd   :  { %p178_p6 = por %p177_p5, %p176_p4 }
   0xf   :  { %p179_p7 = pnand %p178_p6, %p172_p3 }
  0x11   :  { %182 = shalt.err (!%p179_p7)
}
  0x12   :  { %20 = dma.hbm_to_vmem [thread:$0]  %s297_s0, 32, %s18_s13, [#allocation3]  }
  0x13   :  { %s183_s28 = scalar_lea.hbm %s298_s1, 128 }
  0x14   :  { %p184_p8 = scmp.ne.s32.totalorder %s298_s1, %s183_s28  ;;  %p187_p9 = scmp.lt.u32.totalorder %s183_s28, %s298_s1 }
  0x16   :  { %p189_p10 = pnand %p187_p9, %p184_p8 }
  0x18   :  { %192 = shalt.err (!%p189_p10)
}
  0x19   :  { %s193_s6 = scalar_lea.vmem %s28_s15, 128  ;;  %p198_p12 = scmp.lt.s32.totalorder %s28_s15, %s28_s15 }
  0x1a   :  { %p194_p11 = scmp.ne.s32.totalorder %s28_s15, %s193_s6  ;;  %p199_p13 = scmp.lt.s32.totalorder %s193_s6, %s193_s6 }
  0x1c   :  { %p200_p0 = por %p199_p13, %p198_p12 }
  0x1e   :  { %p201_p1 = pnand %p200_p0, %p194_p11 }
  0x20   :  { %204 = shalt.err (!%p201_p1)
}
  0x21   :  { %30 = dma.hbm_to_vmem [thread:$0]  %s298_s1, 128, %s28_s15, [#allocation6]  }
  0x22   :  { %227 = dma.done.wait [#allocation3], 32  }
  0x23   :  { %228 = vsyncadd [#allocation3], 4294967264 }
  0x24   :  { %229 = dma.done.wait [#allocation6], 128  }
  0x25   :  { %230 = vsyncadd [#allocation6], 4294967168  ;;  %v235_v0 = vmov 0.0   ;;  %vm236_vm0 = vmmov 0   ;;  %vm48_vm1 = vcmask 64512   ;;  %v40_v1 = vld [vmem:[#allocation5] sm:$0xff] }
  0x26   :  { %151 = vmatprep.subr.mxu0 %v235_v0  ;;  %153 = vmatprep.mubr.msk.f32.mxu0 %vm236_vm0, %v235_v0  ;;  %v39_v2 = vld [vmem:[#allocation2] sm:$0x3]  ;;  %s237_s1 = smov [#allocation7]   ;;  %vm128_vm3 = vcmask 58368  }
  0x27   :  { %152 = vmatpush3.xpose.msk.msra.mxu0 %vm48_vm1, %v40_v1  ;;  %v146_v3 = vld [vmem:[%s299_s2] ss:$0 sm:$0xff]  ;;  %s136_s10 = sshll.u32 %s237_s1, 4  ;;  %s137_s10 = int_to_ptr.vmem [resolvable:$true] %s136_s10 }
  0x28   :  { %s205_s11 = scalar_lea.vmem %s137_s10, 32  ;;  %p210_p3 = scmp.lt.s32.totalorder %s137_s10, %s137_s10 }
  0x29   :  { %p206_p2 = scmp.ne.s32.totalorder %s137_s10, %s205_s11  ;;  %p211_p4 = scmp.lt.s32.totalorder %s205_s11, %s205_s11 }
  0x2a   :  { %154 = vmatmul.mubr.msk.f32.vlgmr.msra.gmra.mrb[0].mxu0 %vm48_vm1, %v39_v2 }
  0x2b   :  { %p212_p5 = por %p211_p4, %p210_p3 }
  0x2d   :  { %p213_p6 = pnand %p212_p5, %p206_p2 }
  0xfd   :  { %v121_v4 = vpop.f32.mrb[0].mxu0 }
  0xfe   :  { %v122_v5 = vadd.f32 %v146_v3, %v121_v4  ;;  %v155_v6 = vpop.f32.mrb[1].mxu0 }
 0x100   :  { %vm125_vm2 = vcmp.ge.f32.partialorder %v122_v5, 0.0  ;;  %v126_v7 = vmul.f32 0.2, %v122_v5 }
 0x102   :  { %v127_v8 = vsel %vm125_vm2, %v122_v5, %v126_v7 }
 0x103   :  { %129 = vst.msk [vmem:[#allocation7] sm:$0x3] %vm128_vm3, %v127_v8 }
 0x104   :  { %216 = shalt.err (!%p213_p6)
}
 0x105   :  { %s217_s13 = scalar_lea.hbm %s300_s3, 32 }
 0x106   :  { %p218_p7 = scmp.ne.s32.totalorder %s300_s3, %s217_s13  ;;  %p221_p8 = scmp.lt.u32.totalorder %s217_s13, %s300_s3 }
 0x108   :  { %p223_p9 = pnand %p221_p8, %p218_p7 }
 0x10a   :  { %226 = shalt.err (!%p223_p9)
}
 0x10b   :  { %139 = dma.vmem_to_hbm [thread:$0]  %s137_s10, 32, %s300_s3, [#allocation4]  }
 0x10c   :  { %231 = dma.done.wait [#allocation4], 32  }
 0x10d   :  { %232 = vsyncadd [#allocation4], 4294967264 }
 0x10e   :  { %143 = vsyncpa [#allocation3], 1 }
 0x10f   :  { %144 = vsyncpa [#allocation6], 1 }
 0x110   :  { %145 = vsyncpa [#allocation4], 1 }

</bundles_post_ra>
